<compile_context>
chip_gen: v6e
topology: v6e:2x2x1
jax: 0.10.0
libtpu: 0.0.40
codegen_flags: <defaults>
</compile_context>

<pallas_src>
import jax
import jax.numpy as jnp
from jax.experimental import pallas as pl
from jax.experimental.pallas import tpu as pltpu

EPS = 1e-6


def _ln_rows_kernel(gamma_ref, beta_ref, x_ref, o_ref):
    """Standard path: one normalized row per sublane row (H on the lane axis)."""
    x = x_ref[...].astype(jnp.float32)                      # (tile_rows, H)
    h = x.shape[-1]
    mean = jnp.mean(x, axis=-1, keepdims=True)
    diff = x - mean
    # torch.std default is unbiased (divide by N-1).  H == 1 is degenerate
    # (torch would yield NaN); divisor clamped to keep the kernel finite.
    ssq = jnp.sum(diff * diff, axis=-1, keepdims=True)
    std = jnp.sqrt(ssq * (1.0 / max(h - 1, 1)))
    # Per-row reciprocal on the EUP, gamma folded into the scale.
    scale = gamma_ref[0, 0] * pl.reciprocal(std + EPS, approx=True)
    o_ref[...] = (diff * scale + beta_ref[0, 0]).astype(o_ref.dtype)


def _ln_packed_kernel(gamma_ref, beta_ref, s_ref, st_ref, x_ref, o_ref):
    """Lane-packed path: k = 128 // H original rows share one 128-lane row.

    s_ref:  (k*H, k) 0/1 segment matrix (lane j belongs to segment j // H)
    st_ref: (k, k*H) its transpose (broadcast per-segment scalars back to lanes)
    """
    x = x_ref[...].astype(jnp.float32)                      # (T, k*H)
    s = s_ref[...]                                          # (k*H, k)
    st = st_ref[...]                                        # (k, k*H)
    k = s.shape[1]
    h = s.shape[0] // k

    # Per-original-row sums via segment matmul (MXU, otherwise idle here).
    seg_sum = jnp.dot(x, s, preferred_element_type=jnp.float32)        # (T, k)
    mean_b = jnp.dot(seg_sum * (1.0 / h), st,
                     preferred_element_type=jnp.float32)               # (T, k*H)
    diff = x - mean_b
    ssq = jnp.dot(diff * diff, s, preferred_element_type=jnp.float32)  # (T, k)
    std = jnp.sqrt(ssq * (1.0 / max(h - 1, 1)))
    scale = gamma_ref[0, 0] * pl.reciprocal(std + EPS, approx=True)    # (T, k)
    scale_b = jnp.dot(scale, st, preferred_element_type=jnp.float32)   # (T, k*H)
    o_ref[...] = (diff * scale_b + beta_ref[0, 0]).astype(o_ref.dtype)


def layer_norm(x, gamma, beta, *, tile_bytes=2 * 1024 * 1024):
    """LayerNorm over the last axis of x (torch.Tensor.std semantics, eps on std)."""
    orig_shape = x.shape
    H = orig_shape[-1]
    xf = x.reshape(-1, H)
    R = xf.shape[0]
    dtype = x.dtype
    itemsize = jnp.dtype(dtype).itemsize

    g = jnp.asarray(gamma, jnp.float32).reshape(1, 1)
    b = jnp.asarray(beta, jnp.float32).reshape(1, 1)

    # Pack k rows per 128-lane register when H is narrow -> lane-dense stores.
    if 1 < H < 128 and 128 % H == 0:
        k = 128 // H
    else:
        k = 1
    lane = k * H

    # Sublane granularity for the input dtype.
    sub = {4: 8, 2: 16, 1: 32}.get(itemsize, 8)

    # Row tile sized by byte budget, capped at the rows actually present.
    packed_rows = -(-R // k)
    packed_rows_rounded = -(-packed_rows // sub) * sub
    tile_rows = max(1, tile_bytes // (lane * itemsize))
    tile_rows = max(sub, (tile_rows // sub) * sub)
    tile_rows = min(tile_rows, packed_rows_rounded)

    num_tiles = pl.cdiv(packed_rows, tile_rows)
    padded_packed_rows = num_tiles * tile_rows
    pad = padded_packed_rows * k - R
    if pad:
        xf = jnp.pad(xf, ((0, pad), (0, 0)))   # zero rows; finite output, sliced off
    xp = xf.reshape(padded_packed_rows, lane)

    # Raise scoped VMEM above the 16/32 MiB defaults but stay within v7x's
    # 64 MiB physical VMEM; tile budget keeps actual usage far below this.
    vmem_limit = max(32 << 20, min(int(6 * tile_bytes), 48 << 20))
    compiler_params = pltpu.CompilerParams(
        dimension_semantics=("parallel",),     # v7x: split row grid over 2 TCs
        vmem_limit_bytes=vmem_limit,
    )

    x_spec = pl.BlockSpec((tile_rows, lane), lambda i: (i, 0))
    out_spec = pl.BlockSpec((tile_rows, lane), lambda i: (i, 0))
    smem = pl.BlockSpec(memory_space=pltpu.MemorySpace.SMEM)

    if k == 1:
        out = pl.pallas_call(
            _ln_rows_kernel,
            out_shape=jax.ShapeDtypeStruct((padded_packed_rows, lane), dtype),
            grid=(num_tiles,),
            in_specs=[smem, smem, x_spec],
            out_specs=out_spec,
            compiler_params=compiler_params,
        )(g, b, xp)
    else:
        seg = jnp.arange(lane) // H
        s_mat = (seg[:, None] == jnp.arange(k)[None, :]).astype(jnp.float32)
        st_mat = s_mat.T
        out = pl.pallas_call(
            _ln_packed_kernel,
            out_shape=jax.ShapeDtypeStruct((padded_packed_rows, lane), dtype),
            grid=(num_tiles,),
            in_specs=[
                smem, smem,
                pl.BlockSpec((lane, k), lambda i: (0, 0)),   # segment matrix
                pl.BlockSpec((k, lane), lambda i: (0, 0)),   # its transpose
                x_spec,
            ],
            out_specs=out_spec,
            compiler_params=compiler_params,
        )(g, b, s_mat, st_mat, xp)

    out = out.reshape(padded_packed_rows * k, H)[:R]
    return out.reshape(orig_shape)


def layer_norm_ref(x, gamma, beta):
    # Pure-JAX reference of the same (torch) semantics, for verification.
    xf = x.astype(jnp.float32)
    mean = jnp.mean(xf, axis=-1, keepdims=True)
    var = jnp.sum((xf - mean) ** 2, axis=-1, keepdims=True) / (x.shape[-1] - 1)
    std = jnp.sqrt(var)
    return (gamma * (xf - mean) / (std + EPS) + beta).astype(x.dtype)


if __name__ == "__main__":
    key = jax.random.PRNGKey(0)
    key1, key2 = jax.random.split(key)

    # Deterministic parameter init matching the module's __init__:
    gamma = jnp.ones((1,), dtype=jnp.float32)
    beta = jnp.zeros((1,), dtype=jnp.float32)

    # batch=2, seq=8, hidden=32 — exercises the lane-packed (H < 128) path.
    x = jax.random.normal(key1, (2, 8, 32), dtype=jnp.float32)
    out = jax.block_until_ready(layer_norm(x, gamma, beta))
    ref = layer_norm_ref(x, gamma[0], beta[0])
    assert out.shape == x.shape and out.dtype == x.dtype
    # approx EUP reciprocal introduces ~1e-3 relative error -> tolerance set accordingly
    assert jnp.allclose(out, ref, atol=1e-2, rtol=1e-2)

    # Second small case (H >= 128, non-divisible row count) — standard path + padding.
    x2 = jax.random.normal(key2, (4, 3, 256), dtype=jnp.float32)
    out2 = jax.block_until_ready(layer_norm(x2, gamma, beta))
    ref2 = layer_norm_ref(x2, gamma[0], beta[0])
    assert out2.shape == x2.shape and out2.dtype == x2.dtype
    assert jnp.allclose(out2, ref2, atol=1e-2, rtol=1e-2)

    print("KERNEL_OK")
</pallas_src>

<mosaic_0001>
module attributes {stable_mosaic.version = 11 : i64} {
  func.func @_ln_packed_kernel(%arg0: i32, %arg1: memref<1x1xf32, #tpu.memory_space<smem>>, %arg2: memref<1x1xf32, #tpu.memory_space<smem>>, %arg3: memref<128x4xf32, #tpu.memory_space<vmem>>, %arg4: memref<4x128xf32, #tpu.memory_space<vmem>>, %arg5: memref<8x128xf32, #tpu.memory_space<vmem>>, %arg6: memref<8x128xf32, #tpu.memory_space<vmem>>) attributes {dimension_semantics = [#tpu.dimension_semantics<parallel>], iteration_bounds = array<i64: 1>, scalar_prefetch = 0 : i64, scratch_operands = 0 : i64, tpu.core_type = #tpu.core_type<tc>, window_params = [{transform_indices = @transform_0, window_bounds = array<i64: 1, 1>}, {transform_indices = @transform_1, window_bounds = array<i64: 1, 1>}, {pipeline_mode = #tpu.pipeline_mode<synchronous>, transform_indices = @transform_2, window_bounds = array<i64: 128, 4>}, {pipeline_mode = #tpu.pipeline_mode<synchronous>, transform_indices = @transform_3, window_bounds = array<i64: 4, 128>}, {transform_indices = @transform_4, window_bounds = array<i64: 8, 128>}, {transform_indices = @transform_5, window_bounds = array<i64: 8, 128>}]} {
    %c0 = arith.constant 0 : index
    %c0_0 = arith.constant 0 : index
    %0 = vector.load %arg5[%c0, %c0_0] : memref<8x128xf32, #tpu.memory_space<vmem>>, vector<8x128xf32>
    %c0_1 = arith.constant 0 : index
    %c0_2 = arith.constant 0 : index
    %1 = vector.load %arg3[%c0_1, %c0_2] : memref<128x4xf32, #tpu.memory_space<vmem>>, vector<128x4xf32>
    %c0_3 = arith.constant 0 : index
    %c0_4 = arith.constant 0 : index
    %2 = vector.load %arg4[%c0_3, %c0_4] : memref<4x128xf32, #tpu.memory_space<vmem>>, vector<4x128xf32>
    %cst = arith.constant dense<0.000000e+00> : vector<8x4xf32>
    %3 = tpu.matmul %0, %1, %cst {dimension_numbers = #tpu.dot_dimension_numbers<[1], [0], [0], [1], [0, 0, 1, 1], [], []>} : vector<8x128xf32>, vector<128x4xf32>, vector<8x4xf32> -> vector<8x4xf32>
    %cst_5 = arith.constant 3.125000e-02 : f32
    %4 = vector.broadcast %cst_5 : f32 to vector<8x4xf32>
    %5 = arith.mulf %3, %4 : vector<8x4xf32>
    %cst_6 = arith.constant dense<0.000000e+00> : vector<8x128xf32>
    %6 = tpu.matmul %5, %2, %cst_6 {dimension_numbers = #tpu.dot_dimension_numbers<[1], [0], [0], [1], [0, 0, 1, 1], [], []>} : vector<8x4xf32>, vector<4x128xf32>, vector<8x128xf32> -> vector<8x128xf32>
    %7 = arith.subf %0, %6 : vector<8x128xf32>
    %8 = arith.mulf %7, %7 : vector<8x128xf32>
    %cst_7 = arith.constant dense<0.000000e+00> : vector<8x4xf32>
    %9 = tpu.matmul %8, %1, %cst_7 {dimension_numbers = #tpu.dot_dimension_numbers<[1], [0], [0], [1], [0, 0, 1, 1], [], []>} : vector<8x128xf32>, vector<128x4xf32>, vector<8x4xf32> -> vector<8x4xf32>
    %cst_8 = arith.constant 0.0322580636 : f32
    %10 = vector.broadcast %cst_8 : f32 to vector<8x4xf32>
    %11 = arith.mulf %9, %10 : vector<8x4xf32>
    %12 = math.sqrt %11 : vector<8x4xf32>
    %c0_9 = arith.constant 0 : index
    %c0_10 = arith.constant 0 : index
    %13 = memref.load %arg1[%c0_9, %c0_10] : memref<1x1xf32, #tpu.memory_space<smem>>
    %cst_11 = arith.constant 9.99999997E-7 : f32
    %14 = vector.broadcast %cst_11 : f32 to vector<8x4xf32>
    %15 = arith.addf %12, %14 : vector<8x4xf32>
    %16 = tpu.reciprocal %15 {approx = true} : vector<8x4xf32> -> vector<8x4xf32>
    %17 = vector.broadcast %13 : f32 to vector<8x4xf32>
    %18 = arith.mulf %17, %16 : vector<8x4xf32>
    %cst_12 = arith.constant dense<0.000000e+00> : vector<8x128xf32>
    %19 = tpu.matmul %18, %2, %cst_12 {dimension_numbers = #tpu.dot_dimension_numbers<[1], [0], [0], [1], [0, 0, 1, 1], [], []>} : vector<8x4xf32>, vector<4x128xf32>, vector<8x128xf32> -> vector<8x128xf32>
    %20 = arith.mulf %7, %19 : vector<8x128xf32>
    %c0_13 = arith.constant 0 : index
    %c0_14 = arith.constant 0 : index
    %21 = memref.load %arg2[%c0_13, %c0_14] : memref<1x1xf32, #tpu.memory_space<smem>>
    %22 = vector.broadcast %21 : f32 to vector<8x128xf32>
    %23 = arith.addf %20, %22 : vector<8x128xf32>
    %c0_15 = arith.constant 0 : index
    %c0_16 = arith.constant 0 : index
    %24 = vector.load %arg6[%c0_15, %c0_16] : memref<8x128xf32, #tpu.memory_space<vmem>>, vector<8x128xf32>
    tpu.vector_store %arg6[%c0_15, %c0_16], %23 {strides = array<i32>} : memref<8x128xf32, #tpu.memory_space<vmem>>, vector<8x128xf32>,
    return
  }
  func.func @transform_0(%arg0: i32) -> (i32, i32) {
    %c0_i32 = arith.constant 0 : i32
    %c0_i32_0 = arith.constant 0 : i32
    %c0_i32_1 = arith.constant 0 : i32
    return %c0_i32, %c0_i32_0 : i32, i32
  }
  func.func @transform_1(%arg0: i32) -> (i32, i32) {
    %c0_i32 = arith.constant 0 : i32
    %c0_i32_0 = arith.constant 0 : i32
    %c0_i32_1 = arith.constant 0 : i32
    return %c0_i32, %c0_i32_0 : i32, i32
  }
  func.func @transform_2(%arg0: i32) -> (i32, i32) {
    %c0_i32 = arith.constant 0 : i32
    %c0_i32_0 = arith.constant 0 : i32
    %c0_i32_1 = arith.constant 0 : i32
    return %c0_i32, %c0_i32_0 : i32, i32
  }
  func.func @transform_3(%arg0: i32) -> (i32, i32) {
    %c0_i32 = arith.constant 0 : i32
    %c0_i32_0 = arith.constant 0 : i32
    %c0_i32_1 = arith.constant 0 : i32
    return %c0_i32, %c0_i32_0 : i32, i32
  }
  func.func @transform_4(%arg0: i32) -> (i32, i32) {
    %c0_i32 = arith.constant 0 : i32
    %c0_i32_0 = arith.constant 0 : i32
    return %arg0, %c0_i32 : i32, i32
  }
  func.func @transform_5(%arg0: i32) -> (i32, i32) {
    %c0_i32 = arith.constant 0 : i32
    %c0_i32_0 = arith.constant 0 : i32
    return %arg0, %c0_i32 : i32, i32
  }
}

</mosaic_0001>

<bundles_post_ra>
// kernel: tpu_custom_call.1
= control target key start
LH: loop header
LB: loop body
LE: loop exit
PB: predicated region body
PF: predicated region fallthrough
CT: control target
= control target key end

     0   :  { %v518_v1 = vmov 0.0   ;;  %vm519_vm0 = vmmov 0   ;;  %s670_s0 = inlined_call_operand.<no memory space> [shape: f32[1,1], index: 0, kind: input, shape index: {}]   ;;  %s671_s1 = inlined_call_operand.<no memory space> [shape: f32[1,1], index: 1, kind: input, shape index: {}]   ;;  %s672_s2 = inlined_call_operand.vmem [shape: f32[128,4], index: 2, kind: input, shape index: {}]   ;;  %s673_s3 = inlined_call_operand.vmem [shape: f32[4,128], index: 3, kind: input, shape index: {}]   ;;  %s674_s4 = inlined_call_operand.vmem [shape: f32[8,128], index: 4, kind: input, shape index: {}]   ;;  %s675_s5 = inlined_call_operand.hbm [shape: f32[8,128], index: 5, kind: output, shape index: {}]  }
   0x1   :  { %v554_v0 = vld [vmem:[%s672_s2 + $0x78] sm:$0xff]  ;;  %409 = vmatprep.subr.mxu0 %v518_v1  ;;  %v560_v2 = vld [vmem:[%s672_s2 + $0x70] sm:$0xff]  ;;  %441 = vmatprep.mubr.msk.f32.mxu0 %vm519_vm0, %v518_v1  ;;  %v570_v3 = vld [vmem:[%s672_s2 + $0x68] sm:$0xff] }
   0x2   :  { %410 = vmatpush3.msra.mxu0 %v554_v0  ;;  %444 = vmatprep.subr.mxu1 %v518_v1  ;;  %v36_v4 = vld [vmem:[%s672_s2 + $0x60] sm:$0xff] }
   0x3   :  { %411 = vmatprep.subr.mxu0 %v518_v1  ;;  %446 = vmatprep.mubr.msk.f32.mxu1 %vm519_vm0, %v518_v1 }
   0x4   :  { %412 = vmatpush3.msra.mxu0 %v560_v2 }
   0x5   :  { %413 = vmatprep.subr.mxu0 %v518_v1 }
   0x6   :  { %12 = vsyncpa [#allocation5], 0  ;;  %414 = vmatpush3.msra.mxu0 %v570_v3  ;;  %v35_v5 = vld [vmem:[%s672_s2 + $0x58] sm:$0xff]  ;;  %v34_v6 = vld [vmem:[%s672_s2 + $0x50] sm:$0xff]  ;;  %vm116_vm1 = vcmask 1043456   ;;  %vm112_vm2 = vcmask 31744   ;;  %v273_v35 = vstv %s670_s0  ;;  %v350_v39 = vstv %s671_s1 }
   0x7   :  { %415 = vmatprep.subr.mxu0 %v518_v1  ;;  %v33_v7 = vld [vmem:[%s672_s2 + $0x48] sm:$0xff]  ;;  %v32_v8 = vld [vmem:[%s672_s2 + $0x40] sm:$0xff]  ;;  %v31_v9 = vld [vmem:[%s672_s2 + $0x38] sm:$0xff]  ;;  %s520_s30 = smov [#allocation4]  }
   0x8   :  { %416 = vmatpush3.msra.mxu0 %v36_v4  ;;  %v30_v10 = vld [vmem:[%s672_s2 + $0x30] sm:$0xff]  ;;  %v29_v11 = vld [vmem:[%s672_s2 + $0x28] sm:$0xff]  ;;  %v28_v12 = vld [vmem:[%s672_s2 + $0x20] sm:$0xff]  ;;  %s359_s6 = sshll.u32 %s520_s30, 4  ;;  %s360_s6 = int_to_ptr.vmem [resolvable:$true] %s359_s6 }
   0x9   :  { %417 = vmatprep.subr.mxu0 %v518_v1  ;;  %v27_v13 = vld [vmem:[%s672_s2 + $0x18] sm:$0xff]  ;;  %v26_v14 = vld [vmem:[%s672_s2 + $0x10] sm:$0xff]  ;;  %v25_v15 = vld [vmem:[%s672_s2 + $0x8] sm:$0xff]  ;;  %s496_s7 = scalar_lea.vmem %s360_s6, 128  ;;  %p501_p1 = scmp.lt.s32.totalorder %s360_s6, %s360_s6 }
   0xa   :  { %418 = vmatpush3.msra.mxu0 %v35_v5  ;;  %v24_v16 = vld [vmem:[%s672_s2] sm:$0xff]  ;;  %p497_p0 = scmp.ne.s32.totalorder %s360_s6, %s496_s7  ;;  %p502_p2 = scmp.lt.s32.totalorder %s496_s7, %s496_s7 }
   0xb   :  { %419 = vmatprep.subr.mxu0 %v518_v1  ;;  %v23_v17 = vld [vmem:[%s674_s4] sm:$0xff] }
   0xc   :  { %420 = vmatpush3.msra.mxu0 %v34_v6  ;;  %v40_v18 = vld [vmem:[%s673_s3] sm:$0xf]  ;;  %p503_p3 = por %p502_p2, %p501_p1 }
   0xd   :  { %421 = vmatprep.subr.mxu0 %v518_v1  ;;  %445 = vmatpush3.msk.msra.mxu1 %vm116_vm1, %v40_v18 }
   0xe   :  { %422 = vmatpush3.msra.mxu0 %v33_v7  ;;  %449 = vmatprep.subr.mxu1 %v518_v1  ;;  %p504_p4 = pnand %p503_p3, %p497_p0 }
   0xf   :  { %423 = vmatprep.subr.mxu0 %v518_v1 }
  0x10   :  { %424 = vmatpush3.msra.mxu0 %v32_v8 }
  0x11   :  { %425 = vmatprep.subr.mxu0 %v518_v1 }
  0x12   :  { %426 = vmatpush3.msra.mxu0 %v31_v9 }
  0x13   :  { %427 = vmatprep.subr.mxu0 %v518_v1 }
  0x14   :  { %428 = vmatpush3.msra.mxu0 %v30_v10 }
  0x15   :  { %429 = vmatprep.subr.mxu0 %v518_v1 }
  0x16   :  { %430 = vmatpush3.msra.mxu0 %v29_v11 }
  0x17   :  { %431 = vmatprep.subr.mxu0 %v518_v1 }
  0x18   :  { %432 = vmatpush3.msra.mxu0 %v28_v12 }
  0x19   :  { %433 = vmatprep.subr.mxu0 %v518_v1 }
  0x1a   :  { %434 = vmatpush3.msra.mxu0 %v27_v13 }
  0x1b   :  { %435 = vmatprep.subr.mxu0 %v518_v1 }
  0x1c   :  { %436 = vmatpush3.msra.mxu0 %v26_v14 }
  0x1d   :  { %437 = vmatprep.subr.mxu0 %v518_v1 }
  0x1e   :  { %438 = vmatpush3.msra.mxu0 %v25_v15 }
  0x1f   :  { %439 = vmatprep.subr.mxu0 %v518_v1 }
  0x20   :  { %440 = vmatpush3.msra.mxu0 %v24_v16 }
  0x21   :  { %442 = vmatmul.mubr.f32.vlgmr.msra.gmra.mxu0 %v23_v17  ;;  %484 = vmatprep.subr.mxu0 %v518_v1 }
  0x22   :  { %486 = vmatprep.mubr.msk.f32.mxu0 %vm519_vm0, %v518_v1  ;;  %485 = vmatpush3.msk.msra.mxu0 %vm116_vm1, %v40_v18 }
  0xe1   :  { %v107_v19 = vpop.f32.mrf.mxu0 }
  0xe2   :  { %v111_v20 = vmul.f32 0.03125, %v107_v19 }
  0xe3   :  { %v443_v21 = vpop.f32.mrf.mxu0 }
  0xe4   :  { %447 = vmatmul.mubr.msk.f32.vlgmr.msra.gmra.mxu1 %vm112_vm2, %v111_v20 }
  0xe5   :  { %450 = vmatpush3.msra.mxu1 %v554_v0  ;;  %481 = vmatprep.mubr.msk.f32.mxu1 %vm519_vm0, %v518_v1 }
  0xe6   :  { %451 = vmatprep.subr.mxu1 %v518_v1 }
  0xe7   :  { %452 = vmatpush3.msra.mxu1 %v560_v2 }
  0xe8   :  { %453 = vmatprep.subr.mxu1 %v518_v1 }
  0xe9   :  { %454 = vmatpush3.msra.mxu1 %v570_v3 }
  0xea   :  { %455 = vmatprep.subr.mxu1 %v518_v1 }
  0xeb   :  { %456 = vmatpush3.msra.mxu1 %v36_v4 }
  0xec   :  { %457 = vmatprep.subr.mxu1 %v518_v1 }
  0xed   :  { %458 = vmatpush3.msra.mxu1 %v35_v5 }
  0xee   :  { %459 = vmatprep.subr.mxu1 %v518_v1 }
  0xef   :  { %460 = vmatpush3.msra.mxu1 %v34_v6 }
  0xf0   :  { %461 = vmatprep.subr.mxu1 %v518_v1 }
  0xf1   :  { %462 = vmatpush3.msra.mxu1 %v33_v7 }
  0xf2   :  { %463 = vmatprep.subr.mxu1 %v518_v1 }
  0xf3   :  { %464 = vmatpush3.msra.mxu1 %v32_v8 }
  0xf4   :  { %465 = vmatprep.subr.mxu1 %v518_v1 }
  0xf5   :  { %466 = vmatpush3.msra.mxu1 %v31_v9 }
  0xf6   :  { %467 = vmatprep.subr.mxu1 %v518_v1 }
  0xf7   :  { %468 = vmatpush3.msra.mxu1 %v30_v10 }
  0xf8   :  { %469 = vmatprep.subr.mxu1 %v518_v1 }
  0xf9   :  { %470 = vmatpush3.msra.mxu1 %v29_v11 }
  0xfa   :  { %471 = vmatprep.subr.mxu1 %v518_v1 }
  0xfb   :  { %472 = vmatpush3.msra.mxu1 %v28_v12 }
  0xfc   :  { %473 = vmatprep.subr.mxu1 %v518_v1 }
  0xfd   :  { %474 = vmatpush3.msra.mxu1 %v27_v13 }
  0xfe   :  { %475 = vmatprep.subr.mxu1 %v518_v1 }
  0xff   :  { %476 = vmatpush3.msra.mxu1 %v26_v14 }
 0x100   :  { %477 = vmatprep.subr.mxu1 %v518_v1 }
 0x101   :  { %478 = vmatpush3.msra.mxu1 %v25_v15 }
 0x102   :  { %479 = vmatprep.subr.mxu1 %v518_v1 }
 0x103   :  { %480 = vmatpush3.msra.mxu1 %v24_v16 }
 0x1a4   :  { %v186_v22 = vpop.f32.mrf.mxu1 }
 0x1a5   :  { %v190_v23 = vsub.f32 %v23_v17, %v186_v22 }
 0x1a6   :  { %v448_v24 = vpop.f32.mrf.mxu1 }
 0x1a7   :  { %v191_v25 = vmul.f32 %v190_v23, %v190_v23 }
 0x1a9   :  { %482 = vmatmul.mubr.f32.vlgmr.msra.gmra.mxu1 %v191_v25 }
 0x269   :  { %v258_v26 = vpop.f32.mrf.mxu1 }
 0x26a   :  { %v262_v27 = vmul.f32 0.032258064, %v258_v26 }
 0x26b   :  { %v483_v28 = vpop.f32.mrf.mxu1 }
 0x26c   :  { %492 = vrsqrt.f32 %v262_v27  ;;  %vm265_vm3 = vcmp.eq.f32.partialorder %v262_v27, inf  ;;  %v268_v31 = vand.u32 2147483648, %v262_v27  ;;  %vm267_vm4 = vcmp.eq.f32.partialorder %v262_v27, 0.0 }
 0x279   :  { %v493_v29 = vpop.eup %492 }
 0x27a   :  { %v264_v30 = vmul.f32 %v493_v29, %v262_v27 }
 0x27c   :  { %v266_v32 = vsel %vm265_vm3, %v262_v27, %v264_v30 }
 0x27d   :  { %v269_v33 = vsel %vm267_vm4, %v268_v31, %v266_v32 }
 0x27e   :  { %v271_v34 = vadd.f32 1e-06, %v269_v33 }
 0x280   :  { %494 = vrcp.f32 %v271_v34 }
 0x28d   :  { %v495_v36 = vpop.eup %494 }
 0x28e   :  { %v274_v37 = vmul.f32 %v495_v36, %v273_v35 }
 0x290   :  { %487 = vmatmul.mubr.msk.f32.vlgmr.msra.gmra.mxu0 %vm112_vm2, %v274_v37 }
 0x350   :  { %v344_v38 = vpop.f32.mrf.mxu0 }
 0x351   :  { %v348_v40 = vmul.f32 %v344_v38, %v190_v23 }
 0x352   :  { %v488_v41 = vpop.f32.mrf.mxu0 }
 0x353   :  { %v351_v42 = vadd.f32 %v350_v39, %v348_v40 }
 0x355   :  { %352 = vst [vmem:[#allocation4] sm:$0xff] %v351_v42 }
 0x356   :  { %507 = shalt.err (!%p504_p4)
}
 0x357   :  { %362 = dma.vmem_to_hbm [thread:$0]  %s360_s6, 128, %s675_s5, [#allocation5]  }
 0x358   :  { %516 = dma.done.wait [#allocation5], 128  }
 0x359   :  { %517 = vsyncadd [#allocation5], 4294967168 }
 0x35a   :  { %366 = vsyncpa [#allocation5], 1 }

</bundles_post_ra>
